<compile_context>
chip_gen: v5e
topology: v5e:2x2
jax: 0.10.0
libtpu: 0.0.40
codegen_flags: <defaults>
</compile_context>

<pallas_src>
import functools

import jax
import jax.numpy as jnp
from jax.experimental import pallas as pl
from jax.experimental.pallas import tpu as pltpu


def single_nn_kernel(x0_ref, x1_ref, w1a_ref, w1b_ref, b1_ref, w2_ref, o_ref,
                     *, N, act_fn):
    # x0_ref / x1_ref / o_ref : (tr, 128) f32 VMEM tiles, batch dense on both axes.
    # w1a/w1b/b1/w2           : (N,) f32 in SMEM, read as broadcast scalars.
    x0 = x0_ref[...]
    x1 = x1_ref[...]

    acc = jnp.zeros_like(x0)
    for n in range(N):                       # static unroll, N is tiny
        h = w1a_ref[n] * x0 + w1b_ref[n] * x1 + b1_ref[n]
        if act_fn == "relu":
            h = jnp.maximum(h, 0.0)
        elif act_fn == "sigmoid":
            h = jax.nn.sigmoid(h)            # EUP
        elif act_fn == "tanh":
            h = jnp.tanh(h)                  # EUP
        # else: no activation (matches the PyTorch module's fall-through)
        acc = acc + w2_ref[n] * h

    o_ref[...] = acc


def single_nn_forward(x, w1, b1, w2, *, act_fn="relu", tb=262144):
    """y = act(x @ w1 + b1) @ w2.

    x  : (B, 2) float32
    w1 : (2, N) float32   (PyTorch l1.weight.T)
    b1 : (N,)   float32   (PyTorch l1.bias)
    w2 : (N,)   float32   (PyTorch l2.weight[0])
    returns (B, 1) float32
    """
    B = x.shape[0]
    N = w1.shape[1]
    LANES, SUBS = 128, 8
    min_tile = LANES * SUBS  # 1024 elements -> (8, 128) minimum dense block

    # Tile size: ~1 MiB per streamed slab per step by default; cap it so that
    # batches large enough to split still yield >= 2 grid steps (v7x dual-TC).
    half = pl.cdiv(pl.cdiv(B, 2), min_tile) * min_tile
    tb = max(min_tile, min(tb, half))
    b_pad = pl.cdiv(B, tb) * tb
    rows = b_pad // LANES          # sublane-rows of the packed slabs
    tr = tb // LANES               # sublane-rows per grid step (multiple of 8)
    grid = (b_pad // tb,)

    xf = x.astype(jnp.float32)
    # Packed dense layout, one (rows, 128) slab per input feature. Single
    # pad+reshape op per feature; a producer could emit this layout directly.
    x0 = jnp.zeros((b_pad,), jnp.float32).at[:B].set(xf[:, 0]).reshape(rows, LANES)
    x1 = jnp.zeros((b_pad,), jnp.float32).at[:B].set(xf[:, 1]).reshape(rows, LANES)

    w1a = w1[0, :].astype(jnp.float32)       # (N,)
    w1b = w1[1, :].astype(jnp.float32)       # (N,)
    b1v = b1.reshape(N).astype(jnp.float32)  # (N,)
    w2v = w2.reshape(N).astype(jnp.float32)  # (N,)

    transcendentals = 0 if act_fn == "relu" else N * b_pad
    cost = pl.CostEstimate(
        flops=7 * N * b_pad,                 # ~2 FMA + bias + act + w2 FMA per unit
        transcendentals=transcendentals,
        bytes_accessed=12 * b_pad + 16 * N,  # dense: 8 B/row in + 4 B/row out
    )

    kernel = functools.partial(single_nn_kernel, N=N, act_fn=act_fn)
    smem_spec = pl.BlockSpec(memory_space=pltpu.MemorySpace.SMEM)

    y_slab = pl.pallas_call(
        kernel,
        out_shape=jax.ShapeDtypeStruct((rows, LANES), jnp.float32),
        grid_spec=pltpu.PrefetchScalarGridSpec(
            num_scalar_prefetch=0,
            grid=grid,
            in_specs=[
                pl.BlockSpec((tr, LANES), lambda i: (i, 0)),   # x0 tile, streamed
                pl.BlockSpec((tr, LANES), lambda i: (i, 0)),   # x1 tile, streamed
                smem_spec,                                     # w1 col 0 (SMEM scalars)
                smem_spec,                                     # w1 col 1
                smem_spec,                                     # b1
                smem_spec,                                     # w2
            ],
            out_specs=pl.BlockSpec((tr, LANES), lambda i: (i, 0)),  # dense output slab
        ),
        compiler_params=pltpu.CompilerParams(
            dimension_semantics=("parallel",),   # megacore / v7x dual-TC sharding
        ),
        cost_estimate=cost,
    )(x0, x1, w1a, w1b, b1v, w2v)

    # Padded rows hold act(b1)·w2 garbage -> slice them off.
    return y_slab.reshape(b_pad)[:B].reshape(B, 1)


if __name__ == "__main__":
    N = 10          # hidden width, matches nn.Linear(2, N)
    B = 8           # batch of 2-D points

    key = jax.random.PRNGKey(0)
    kx, kw1, kb1, kw2 = jax.random.split(key, 4)

    # Deterministic synthetic params (PyTorch shapes: l1.weight (N,2),
    # l1.bias (N,), l2.weight (1,N)); stored transposed/flattened for the kernel.
    x = jax.random.normal(kx, (B, 2), dtype=jnp.float32)
    w1 = jax.random.normal(kw1, (2, N), dtype=jnp.float32) * 0.5   # l1.weight.T
    b1 = jax.random.normal(kb1, (N,), dtype=jnp.float32) * 0.1     # l1.bias
    w2 = jax.random.normal(kw2, (N,), dtype=jnp.float32) * 0.5     # l2.weight[0]

    y = single_nn_forward(x, w1, b1, w2, act_fn="relu")
    jax.block_until_ready(y)

    # Pure-JAX reference (same semantics as the PyTorch forward with relu).
    y_ref = jnp.maximum(x @ w1 + b1[None, :], 0.0) @ w2.reshape(N, 1)
    assert y.shape == (B, 1)
    assert jnp.allclose(y, y_ref, atol=1e-5, rtol=1e-5)

    print("KERNEL_OK")
</pallas_src>

<mosaic_0001>
module attributes {stable_mosaic.version = 11 : i64} {
  func.func @single_nn_kernel(%arg0: i32, %arg1: memref<8x128xf32, #tpu.memory_space<vmem>>, %arg2: memref<8x128xf32, #tpu.memory_space<vmem>>, %arg3: memref<10xf32, #tpu.memory_space<smem>>, %arg4: memref<10xf32, #tpu.memory_space<smem>>, %arg5: memref<10xf32, #tpu.memory_space<smem>>, %arg6: memref<10xf32, #tpu.memory_space<smem>>, %arg7: memref<8x128xf32, #tpu.memory_space<vmem>>) attributes {dimension_semantics = [#tpu.dimension_semantics<parallel>], iteration_bounds = array<i64: 1>, scalar_prefetch = 0 : i64, scratch_operands = 0 : i64, tpu.core_type = #tpu.core_type<tc>, window_params = [{transform_indices = @transform_0, window_bounds = array<i64: 8, 128>}, {transform_indices = @transform_1, window_bounds = array<i64: 8, 128>}, {transform_indices = @transform_2, window_bounds = array<i64: 10>}, {transform_indices = @transform_3, window_bounds = array<i64: 10>}, {transform_indices = @transform_4, window_bounds = array<i64: 10>}, {transform_indices = @transform_5, window_bounds = array<i64: 10>}, {transform_indices = @transform_6, window_bounds = array<i64: 8, 128>}]} {
    %c0 = arith.constant 0 : index
    %c0_0 = arith.constant 0 : index
    %0 = vector.load %arg1[%c0, %c0_0] : memref<8x128xf32, #tpu.memory_space<vmem>>, vector<8x128xf32>
    %c0_1 = arith.constant 0 : index
    %c0_2 = arith.constant 0 : index
    %1 = vector.load %arg2[%c0_1, %c0_2] : memref<8x128xf32, #tpu.memory_space<vmem>>, vector<8x128xf32>
    %cst = arith.constant 0.000000e+00 : f32
    %2 = vector.broadcast %cst : f32 to vector<8x128xf32>
    %c0_3 = arith.constant 0 : index
    %3 = memref.load %arg3[%c0_3] : memref<10xf32, #tpu.memory_space<smem>>
    %4 = vector.broadcast %3 : f32 to vector<8x128xf32>
    %5 = arith.mulf %4, %0 : vector<8x128xf32>
    %c0_4 = arith.constant 0 : index
    %6 = memref.load %arg4[%c0_4] : memref<10xf32, #tpu.memory_space<smem>>
    %7 = vector.broadcast %6 : f32 to vector<8x128xf32>
    %8 = arith.mulf %7, %1 : vector<8x128xf32>
    %9 = arith.addf %5, %8 : vector<8x128xf32>
    %c0_5 = arith.constant 0 : index
    %10 = memref.load %arg5[%c0_5] : memref<10xf32, #tpu.memory_space<smem>>
    %11 = vector.broadcast %10 : f32 to vector<8x128xf32>
    %12 = arith.addf %9, %11 : vector<8x128xf32>
    %cst_6 = arith.constant 0.000000e+00 : f32
    %13 = vector.broadcast %cst_6 : f32 to vector<8x128xf32>
    %14 = arith.maximumf %12, %13 : vector<8x128xf32>
    %c0_7 = arith.constant 0 : index
    %15 = memref.load %arg6[%c0_7] : memref<10xf32, #tpu.memory_space<smem>>
    %16 = vector.broadcast %15 : f32 to vector<8x128xf32>
    %17 = arith.mulf %16, %14 : vector<8x128xf32>
    %18 = arith.addf %2, %17 : vector<8x128xf32>
    %c1 = arith.constant 1 : index
    %19 = memref.load %arg3[%c1] : memref<10xf32, #tpu.memory_space<smem>>
    %20 = vector.broadcast %19 : f32 to vector<8x128xf32>
    %21 = arith.mulf %20, %0 : vector<8x128xf32>
    %c1_8 = arith.constant 1 : index
    %22 = memref.load %arg4[%c1_8] : memref<10xf32, #tpu.memory_space<smem>>
    %23 = vector.broadcast %22 : f32 to vector<8x128xf32>
    %24 = arith.mulf %23, %1 : vector<8x128xf32>
    %25 = arith.addf %21, %24 : vector<8x128xf32>
    %c1_9 = arith.constant 1 : index
    %26 = memref.load %arg5[%c1_9] : memref<10xf32, #tpu.memory_space<smem>>
    %27 = vector.broadcast %26 : f32 to vector<8x128xf32>
    %28 = arith.addf %25, %27 : vector<8x128xf32>
    %cst_10 = arith.constant 0.000000e+00 : f32
    %29 = vector.broadcast %cst_10 : f32 to vector<8x128xf32>
    %30 = arith.maximumf %28, %29 : vector<8x128xf32>
    %c1_11 = arith.constant 1 : index
    %31 = memref.load %arg6[%c1_11] : memref<10xf32, #tpu.memory_space<smem>>
    %32 = vector.broadcast %31 : f32 to vector<8x128xf32>
    %33 = arith.mulf %32, %30 : vector<8x128xf32>
    %34 = arith.addf %18, %33 : vector<8x128xf32>
    %c2 = arith.constant 2 : index
    %35 = memref.load %arg3[%c2] : memref<10xf32, #tpu.memory_space<smem>>
    %36 = vector.broadcast %35 : f32 to vector<8x128xf32>
    %37 = arith.mulf %36, %0 : vector<8x128xf32>
    %c2_12 = arith.constant 2 : index
    %38 = memref.load %arg4[%c2_12] : memref<10xf32, #tpu.memory_space<smem>>
    %39 = vector.broadcast %38 : f32 to vector<8x128xf32>
    %40 = arith.mulf %39, %1 : vector<8x128xf32>
    %41 = arith.addf %37, %40 : vector<8x128xf32>
    %c2_13 = arith.constant 2 : index
    %42 = memref.load %arg5[%c2_13] : memref<10xf32, #tpu.memory_space<smem>>
    %43 = vector.broadcast %42 : f32 to vector<8x128xf32>
    %44 = arith.addf %41, %43 : vector<8x128xf32>
    %cst_14 = arith.constant 0.000000e+00 : f32
    %45 = vector.broadcast %cst_14 : f32 to vector<8x128xf32>
    %46 = arith.maximumf %44, %45 : vector<8x128xf32>
    %c2_15 = arith.constant 2 : index
    %47 = memref.load %arg6[%c2_15] : memref<10xf32, #tpu.memory_space<smem>>
    %48 = vector.broadcast %47 : f32 to vector<8x128xf32>
    %49 = arith.mulf %48, %46 : vector<8x128xf32>
    %50 = arith.addf %34, %49 : vector<8x128xf32>
    %c3 = arith.constant 3 : index
    %51 = memref.load %arg3[%c3] : memref<10xf32, #tpu.memory_space<smem>>
    %52 = vector.broadcast %51 : f32 to vector<8x128xf32>
    %53 = arith.mulf %52, %0 : vector<8x128xf32>
    %c3_16 = arith.constant 3 : index
    %54 = memref.load %arg4[%c3_16] : memref<10xf32, #tpu.memory_space<smem>>
    %55 = vector.broadcast %54 : f32 to vector<8x128xf32>
    %56 = arith.mulf %55, %1 : vector<8x128xf32>
    %57 = arith.addf %53, %56 : vector<8x128xf32>
    %c3_17 = arith.constant 3 : index
    %58 = memref.load %arg5[%c3_17] : memref<10xf32, #tpu.memory_space<smem>>
    %59 = vector.broadcast %58 : f32 to vector<8x128xf32>
    %60 = arith.addf %57, %59 : vector<8x128xf32>
    %cst_18 = arith.constant 0.000000e+00 : f32
    %61 = vector.broadcast %cst_18 : f32 to vector<8x128xf32>
    %62 = arith.maximumf %60, %61 : vector<8x128xf32>
    %c3_19 = arith.constant 3 : index
    %63 = memref.load %arg6[%c3_19] : memref<10xf32, #tpu.memory_space<smem>>
    %64 = vector.broadcast %63 : f32 to vector<8x128xf32>
    %65 = arith.mulf %64, %62 : vector<8x128xf32>
    %66 = arith.addf %50, %65 : vector<8x128xf32>
    %c4 = arith.constant 4 : index
    %67 = memref.load %arg3[%c4] : memref<10xf32, #tpu.memory_space<smem>>
    %68 = vector.broadcast %67 : f32 to vector<8x128xf32>
    %69 = arith.mulf %68, %0 : vector<8x128xf32>
    %c4_20 = arith.constant 4 : index
    %70 = memref.load %arg4[%c4_20] : memref<10xf32, #tpu.memory_space<smem>>
    %71 = vector.broadcast %70 : f32 to vector<8x128xf32>
    %72 = arith.mulf %71, %1 : vector<8x128xf32>
    %73 = arith.addf %69, %72 : vector<8x128xf32>
    %c4_21 = arith.constant 4 : index
    %74 = memref.load %arg5[%c4_21] : memref<10xf32, #tpu.memory_space<smem>>
    %75 = vector.broadcast %74 : f32 to vector<8x128xf32>
    %76 = arith.addf %73, %75 : vector<8x128xf32>
    %cst_22 = arith.constant 0.000000e+00 : f32
    %77 = vector.broadcast %cst_22 : f32 to vector<8x128xf32>
    %78 = arith.maximumf %76, %77 : vector<8x128xf32>
    %c4_23 = arith.constant 4 : index
    %79 = memref.load %arg6[%c4_23] : memref<10xf32, #tpu.memory_space<smem>>
    %80 = vector.broadcast %79 : f32 to vector<8x128xf32>
    %81 = arith.mulf %80, %78 : vector<8x128xf32>
    %82 = arith.addf %66, %81 : vector<8x128xf32>
    %c5 = arith.constant 5 : index
    %83 = memref.load %arg3[%c5] : memref<10xf32, #tpu.memory_space<smem>>
    %84 = vector.broadcast %83 : f32 to vector<8x128xf32>
    %85 = arith.mulf %84, %0 : vector<8x128xf32>
    %c5_24 = arith.constant 5 : index
    %86 = memref.load %arg4[%c5_24] : memref<10xf32, #tpu.memory_space<smem>>
    %87 = vector.broadcast %86 : f32 to vector<8x128xf32>
    %88 = arith.mulf %87, %1 : vector<8x128xf32>
    %89 = arith.addf %85, %88 : vector<8x128xf32>
    %c5_25 = arith.constant 5 : index
    %90 = memref.load %arg5[%c5_25] : memref<10xf32, #tpu.memory_space<smem>>
    %91 = vector.broadcast %90 : f32 to vector<8x128xf32>
    %92 = arith.addf %89, %91 : vector<8x128xf32>
    %cst_26 = arith.constant 0.000000e+00 : f32
    %93 = vector.broadcast %cst_26 : f32 to vector<8x128xf32>
    %94 = arith.maximumf %92, %93 : vector<8x128xf32>
    %c5_27 = arith.constant 5 : index
    %95 = memref.load %arg6[%c5_27] : memref<10xf32, #tpu.memory_space<smem>>
    %96 = vector.broadcast %95 : f32 to vector<8x128xf32>
    %97 = arith.mulf %96, %94 : vector<8x128xf32>
    %98 = arith.addf %82, %97 : vector<8x128xf32>
    %c6 = arith.constant 6 : index
    %99 = memref.load %arg3[%c6] : memref<10xf32, #tpu.memory_space<smem>>
    %100 = vector.broadcast %99 : f32 to vector<8x128xf32>
    %101 = arith.mulf %100, %0 : vector<8x128xf32>
    %c6_28 = arith.constant 6 : index
    %102 = memref.load %arg4[%c6_28] : memref<10xf32, #tpu.memory_space<smem>>
    %103 = vector.broadcast %102 : f32 to vector<8x128xf32>
    %104 = arith.mulf %103, %1 : vector<8x128xf32>
    %105 = arith.addf %101, %104 : vector<8x128xf32>
    %c6_29 = arith.constant 6 : index
    %106 = memref.load %arg5[%c6_29] : memref<10xf32, #tpu.memory_space<smem>>
    %107 = vector.broadcast %106 : f32 to vector<8x128xf32>
    %108 = arith.addf %105, %107 : vector<8x128xf32>
    %cst_30 = arith.constant 0.000000e+00 : f32
    %109 = vector.broadcast %cst_30 : f32 to vector<8x128xf32>
    %110 = arith.maximumf %108, %109 : vector<8x128xf32>
    %c6_31 = arith.constant 6 : index
    %111 = memref.load %arg6[%c6_31] : memref<10xf32, #tpu.memory_space<smem>>
    %112 = vector.broadcast %111 : f32 to vector<8x128xf32>
    %113 = arith.mulf %112, %110 : vector<8x128xf32>
    %114 = arith.addf %98, %113 : vector<8x128xf32>
    %c7 = arith.constant 7 : index
    %115 = memref.load %arg3[%c7] : memref<10xf32, #tpu.memory_space<smem>>
    %116 = vector.broadcast %115 : f32 to vector<8x128xf32>
    %117 = arith.mulf %116, %0 : vector<8x128xf32>
    %c7_32 = arith.constant 7 : index
    %118 = memref.load %arg4[%c7_32] : memref<10xf32, #tpu.memory_space<smem>>
    %119 = vector.broadcast %118 : f32 to vector<8x128xf32>
    %120 = arith.mulf %119, %1 : vector<8x128xf32>
    %121 = arith.addf %117, %120 : vector<8x128xf32>
    %c7_33 = arith.constant 7 : index
    %122 = memref.load %arg5[%c7_33] : memref<10xf32, #tpu.memory_space<smem>>
    %123 = vector.broadcast %122 : f32 to vector<8x128xf32>
    %124 = arith.addf %121, %123 : vector<8x128xf32>
    %cst_34 = arith.constant 0.000000e+00 : f32
    %125 = vector.broadcast %cst_34 : f32 to vector<8x128xf32>
    %126 = arith.maximumf %124, %125 : vector<8x128xf32>
    %c7_35 = arith.constant 7 : index
    %127 = memref.load %arg6[%c7_35] : memref<10xf32, #tpu.memory_space<smem>>
    %128 = vector.broadcast %127 : f32 to vector<8x128xf32>
    %129 = arith.mulf %128, %126 : vector<8x128xf32>
    %130 = arith.addf %114, %129 : vector<8x128xf32>
    %c8 = arith.constant 8 : index
    %131 = memref.load %arg3[%c8] : memref<10xf32, #tpu.memory_space<smem>>
    %132 = vector.broadcast %131 : f32 to vector<8x128xf32>
    %133 = arith.mulf %132, %0 : vector<8x128xf32>
    %c8_36 = arith.constant 8 : index
    %134 = memref.load %arg4[%c8_36] : memref<10xf32, #tpu.memory_space<smem>>
    %135 = vector.broadcast %134 : f32 to vector<8x128xf32>
    %136 = arith.mulf %135, %1 : vector<8x128xf32>
    %137 = arith.addf %133, %136 : vector<8x128xf32>
    %c8_37 = arith.constant 8 : index
    %138 = memref.load %arg5[%c8_37] : memref<10xf32, #tpu.memory_space<smem>>
    %139 = vector.broadcast %138 : f32 to vector<8x128xf32>
    %140 = arith.addf %137, %139 : vector<8x128xf32>
    %cst_38 = arith.constant 0.000000e+00 : f32
    %141 = vector.broadcast %cst_38 : f32 to vector<8x128xf32>
    %142 = arith.maximumf %140, %141 : vector<8x128xf32>
    %c8_39 = arith.constant 8 : index
    %143 = memref.load %arg6[%c8_39] : memref<10xf32, #tpu.memory_space<smem>>
    %144 = vector.broadcast %143 : f32 to vector<8x128xf32>
    %145 = arith.mulf %144, %142 : vector<8x128xf32>
    %146 = arith.addf %130, %145 : vector<8x128xf32>
    %c9 = arith.constant 9 : index
    %147 = memref.load %arg3[%c9] : memref<10xf32, #tpu.memory_space<smem>>
    %148 = vector.broadcast %147 : f32 to vector<8x128xf32>
    %149 = arith.mulf %148, %0 : vector<8x128xf32>
    %c9_40 = arith.constant 9 : index
    %150 = memref.load %arg4[%c9_40] : memref<10xf32, #tpu.memory_space<smem>>
    %151 = vector.broadcast %150 : f32 to vector<8x128xf32>
    %152 = arith.mulf %151, %1 : vector<8x128xf32>
    %153 = arith.addf %149, %152 : vector<8x128xf32>
    %c9_41 = arith.constant 9 : index
    %154 = memref.load %arg5[%c9_41] : memref<10xf32, #tpu.memory_space<smem>>
    %155 = vector.broadcast %154 : f32 to vector<8x128xf32>
    %156 = arith.addf %153, %155 : vector<8x128xf32>
    %cst_42 = arith.constant 0.000000e+00 : f32
    %157 = vector.broadcast %cst_42 : f32 to vector<8x128xf32>
    %158 = arith.maximumf %156, %157 : vector<8x128xf32>
    %c9_43 = arith.constant 9 : index
    %159 = memref.load %arg6[%c9_43] : memref<10xf32, #tpu.memory_space<smem>>
    %160 = vector.broadcast %159 : f32 to vector<8x128xf32>
    %161 = arith.mulf %160, %158 : vector<8x128xf32>
    %162 = arith.addf %146, %161 : vector<8x128xf32>
    %c0_44 = arith.constant 0 : index
    %c0_45 = arith.constant 0 : index
    %163 = vector.load %arg7[%c0_44, %c0_45] : memref<8x128xf32, #tpu.memory_space<vmem>>, vector<8x128xf32>
    tpu.vector_store %arg7[%c0_44, %c0_45], %162 {strides = array<i32>} : memref<8x128xf32, #tpu.memory_space<vmem>>, vector<8x128xf32>,
    return
  }
  func.func @transform_0(%arg0: i32) -> (i32, i32) {
    %c0_i32 = arith.constant 0 : i32
    %c0_i32_0 = arith.constant 0 : i32
    return %arg0, %c0_i32 : i32, i32
  }
  func.func @transform_1(%arg0: i32) -> (i32, i32) {
    %c0_i32 = arith.constant 0 : i32
    %c0_i32_0 = arith.constant 0 : i32
    return %arg0, %c0_i32 : i32, i32
  }
  func.func @transform_2(%arg0: i32) -> i32 {
    %c0_i32 = arith.constant 0 : i32
    %c0_i32_0 = arith.constant 0 : i32
    return %c0_i32 : i32
  }
  func.func @transform_3(%arg0: i32) -> i32 {
    %c0_i32 = arith.constant 0 : i32
    %c0_i32_0 = arith.constant 0 : i32
    return %c0_i32 : i32
  }
  func.func @transform_4(%arg0: i32) -> i32 {
    %c0_i32 = arith.constant 0 : i32
    %c0_i32_0 = arith.constant 0 : i32
    return %c0_i32 : i32
  }
  func.func @transform_5(%arg0: i32) -> i32 {
    %c0_i32 = arith.constant 0 : i32
    %c0_i32_0 = arith.constant 0 : i32
    return %c0_i32 : i32
  }
  func.func @transform_6(%arg0: i32) -> (i32, i32) {
    %c0_i32 = arith.constant 0 : i32
    %c0_i32_0 = arith.constant 0 : i32
    return %arg0, %c0_i32 : i32, i32
  }
}

</mosaic_0001>

<bundles_post_ra>
// kernel: tpu_custom_call.1
= control target key start
LH: loop header
LB: loop body
LE: loop exit
PB: predicated region body
PF: predicated region fallthrough
CT: control target
= control target key end

     0   :  { %11 = vsyncpa [#allocation3], 0  ;;  %s584_s0 = inlined_call_operand.hbm [shape: f32[8,128], index: 0, kind: input, shape index: {}]   ;;  %s585_s1 = inlined_call_operand.hbm [shape: f32[8,128], index: 1, kind: input, shape index: {}]   ;;  %s586_s2 = inlined_call_operand.vmem [shape: f32[10], index: 2, kind: input, shape index: {}]   ;;  %s587_s3 = inlined_call_operand.vmem [shape: f32[10], index: 3, kind: input, shape index: {}]   ;;  %s588_s4 = inlined_call_operand.vmem [shape: f32[10], index: 4, kind: input, shape index: {}]   ;;  %s589_s5 = inlined_call_operand.vmem [shape: f32[10], index: 5, kind: input, shape index: {}]   ;;  %s590_s6 = inlined_call_operand.hbm [shape: f32[8,128], index: 6, kind: output, shape index: {}]  }
   0x1   :  { %12 = vsyncpa [#allocation7], 0 }
   0x2   :  { %13 = vsyncpa [#allocation5], 0 }
   0x3   :  { %14 = vsyncpa [#allocation10], 0 }
   0x4   :  { %15 = vsyncpa [#allocation13], 0  ;;  %s53_s23 = sshll.u32 %s587_s3, 4  ;;  %s54_s23 = int_to_ptr.vmem [resolvable:$true] %s53_s23 }
   0x5   :  { %16 = vsyncpa [#allocation4], 0  ;;  %s22_s26 = sshll.u32 %s584_s0, 4  ;;  %s449_s27 = smov [#allocation9]   ;;  %s23_s26 = int_to_ptr.hbm [resolvable:$true] %s22_s26 }
   0x6   :  { %56 = dma.vmem_to_smem %s54_s23, 16, %s449_s27, [#allocation10]  }
   0x7   :  { %s450_s28 = smov [#allocation2]   ;;  %s33_s8 = sshll.u32 %s585_s1, 4  ;;  %s34_s8 = int_to_ptr.hbm [resolvable:$true] %s33_s8 }
   0x8   :  { %s24_s29 = sshll.u32 %s450_s28, 4  ;;  %s44_s10 = sshll.u32 %s586_s2, 4  ;;  %s25_s29 = int_to_ptr.vmem [resolvable:$true] %s24_s29  ;;  %s45_s10 = int_to_ptr.vmem [resolvable:$true] %s44_s10 }
   0x9   :  { %27 = dma.hbm_to_vmem [thread:$0]  %s23_s26, 128, %s25_s29, [#allocation3]  }
   0xa   :  { %s451_s11 = smov [#allocation6]   ;;  %s452_s0 = smov [#allocation8]  }
   0xb   :  { %s35_s12 = sshll.u32 %s451_s11, 4  ;;  %s62_s15 = sshll.u32 %s588_s4, 4  ;;  %s36_s12 = int_to_ptr.vmem [resolvable:$true] %s35_s12  ;;  %s63_s15 = int_to_ptr.vmem [resolvable:$true] %s62_s15 }
   0xc   :  { %38 = dma.hbm_to_vmem [thread:$0]  %s34_s8, 128, %s36_s12, [#allocation7]  }
   0xd   :  { %47 = dma.vmem_to_smem %s45_s10, 16, %s452_s0, [#allocation5]  }
   0xe   :  { %s71_s17 = sshll.u32 %s589_s5, 4  ;;  %s453_s18 = smov [#allocation11]   ;;  %s72_s17 = int_to_ptr.vmem [resolvable:$true] %s71_s17 }
   0xf   :  { %65 = dma.vmem_to_smem %s63_s15, 16, %s453_s18, [#allocation10]  }
  0x10   :  { %s454_s2 = smov [#allocation12]  }
  0x11   :  { %74 = dma.vmem_to_smem %s72_s17, 16, %s454_s2, [#allocation13]  }
  0x12   :  { %437 = dma.done.wait [#allocation3], 128  }
  0x13   :  { %438 = vsyncadd [#allocation3], 4294967168 }
  0x14   :  { %439 = dma.done.wait [#allocation7], 128  }
  0x15   :  { %440 = vsyncadd [#allocation7], 4294967168 }
  0x16   :  { %441 = dma.done.wait [#allocation5], 16  }
  0x17   :  { %442 = vsyncadd [#allocation5], 4294967280 }
  0x18   :  { %443 = dma.done.wait [#allocation10], 32  }
  0x19   :  { %444 = vsyncadd [#allocation10], 4294967264 }
  0x1a   :  { %445 = dma.done.wait [#allocation13], 16  }
  0x1b   :  { %446 = vsyncadd [#allocation13], 4294967280 }
  0x1c   :  { %99 = sfence }
  0x1d   :  { %s102_s4 = sld [smem:[#allocation8]]  ;;  %v511_v0 = vld [vmem:[#allocation2] sm:$0xff]  ;;  %v513_v1 = vld [vmem:[#allocation6] sm:$0xff] }
  0x1e   :  { %s105_s19 = sld [smem:[#allocation9]] }
  0x1f   :  { %s109_s20 = sld [smem:[#allocation11]] }
  0x20   :  { %s509_s5 = sld [smem:[#allocation12]] }
  0x21   :  { %s274_s21 = sld [smem:[#allocation8 + $0x1]] }
  0x22   :  { %s275_s22 = sld [smem:[#allocation9 + $0x1]] }
  0x23   :  { %v103_v2 = vstv %s102_s4  ;;  %s276_s23 = sld [smem:[#allocation11 + $0x1]] }
  0x24   :  { %v104_v3 = vmul.f32 %v103_v2, %v511_v0  ;;  %v106_v4 = vstv %s105_s19  ;;  %s516_s24 = sld [smem:[#allocation12 + $0x1]] }
  0x25   :  { %v107_v5 = vmul.f32 %v106_v4, %v513_v1  ;;  %s278_s25 = sld [smem:[#allocation8 + $0x2]]  ;;  %v110_v6 = vstv %s109_s20 }
  0x26   :  { %s279_s26 = sld [smem:[#allocation9 + $0x2]]  ;;  %v114_v17 = vstv %s509_s5 }
  0x27   :  { %v108_v7 = vadd.f32 %v107_v5, %v104_v3  ;;  %v118_v8 = vstv %s274_s21  ;;  %s519_s27 = sld [smem:[#allocation11 + $0x2]] }
  0x28   :  { %v119_v9 = vmul.f32 %v118_v8, %v511_v0  ;;  %v121_v10 = vstv %s275_s22  ;;  %s522_s28 = sld [smem:[#allocation12 + $0x2]] }
  0x29   :  { %v111_v11 = vadd.f32 %v110_v6, %v108_v7  ;;  %v122_v12 = vmul.f32 %v121_v10, %v513_v1  ;;  %s282_s29 = sld [smem:[#allocation8 + $0x3]]  ;;  %v125_v13 = vstv %s276_s23 }
  0x2a   :  { %s283_s30 = sld [smem:[#allocation9 + $0x3]]  ;;  %v129_v22 = vstv %s516_s24 }
  0x2b   :  { %v112_v14 = vmax.f32 %v111_v11, 0.0  ;;  %v123_v15 = vadd.f32 %v122_v12, %v119_v9  ;;  %v133_v16 = vstv %s278_s25  ;;  %s525_s7 = sld [smem:[#allocation11 + $0x3]] }
  0x2c   :  { %v134_v18 = vmul.f32 %v133_v16, %v511_v0  ;;  %v136_v19 = vstv %s279_s26  ;;  %s529_s8 = sld [smem:[#allocation12 + $0x3]] }
  0x2d   :  { %v126_v20 = vadd.f32 %v125_v13, %v123_v15  ;;  %v137_v21 = vmul.f32 %v136_v19, %v513_v1  ;;  %s286_s9 = sld [smem:[#allocation8 + $0x4]]  ;;  %v140_v23 = vstv %s519_s27  ;;  %v115_v24 = vmul.f32 %v114_v17, %v112_v14  ;;  %s455_s27 = smov [#allocation14]  }
  0x2e   :  { %s287_s3 = sld [smem:[#allocation9 + $0x4]]  ;;  %v144_v33 = vstv %s522_s28  ;;  %s258_s28 = sshll.u32 %s455_s27, 4  ;;  %s259_s28 = int_to_ptr.vmem [resolvable:$true] %s258_s28 }
  0x2f   :  { %v127_v25 = vmax.f32 %v126_v20, 0.0  ;;  %v138_v26 = vadd.f32 %v137_v21, %v134_v18  ;;  %v148_v27 = vstv %s282_s29  ;;  %s534_s10 = sld [smem:[#allocation11 + $0x4]] }
  0x30   :  { %v149_v28 = vmul.f32 %v148_v27, %v511_v0  ;;  %v151_v29 = vstv %s283_s30  ;;  %s537_s11 = sld [smem:[#allocation12 + $0x4]] }
  0x31   :  { %v130_v30 = vmul.f32 %v129_v22, %v127_v25  ;;  %v141_v31 = vadd.f32 %v140_v23, %v138_v26  ;;  %v152_v32 = vmul.f32 %v151_v29, %v513_v1  ;;  %s290_s12 = sld [smem:[#allocation8 + $0x5]]  ;;  %v155_v34 = vstv %s525_s7  ;;  %s260_s7 = sshll.u32 %s590_s6, 4  ;;  %s261_s7 = int_to_ptr.hbm [resolvable:$true] %s260_s7 }
  0x32   :  { %s291_s0 = sld [smem:[#allocation9 + $0x5]]  ;;  %v159_v44 = vstv %s529_s8 }
  0x33   :  { %v131_v35 = vadd.f32 %v130_v30, %v115_v24  ;;  %v142_v36 = vmax.f32 %v141_v31, 0.0  ;;  %v153_v37 = vadd.f32 %v152_v32, %v149_v28  ;;  %v163_v38 = vstv %s286_s9  ;;  %s542_s13 = sld [smem:[#allocation11 + $0x5]] }
  0x34   :  { %v164_v39 = vmul.f32 %v163_v38, %v511_v0  ;;  %v166_v40 = vstv %s287_s3  ;;  %s545_s14 = sld [smem:[#allocation12 + $0x5]] }
  0x35   :  { %v145_v41 = vmul.f32 %v144_v33, %v142_v36  ;;  %v156_v42 = vadd.f32 %v155_v34, %v153_v37  ;;  %v167_v43 = vmul.f32 %v166_v40, %v513_v1  ;;  %s294_s15 = sld [smem:[#allocation8 + $0x6]]  ;;  %v170_v45 = vstv %s534_s10 }
  0x36   :  { %s295_s1 = sld [smem:[#allocation9 + $0x6]]  ;;  %v174_v55 = vstv %s537_s11 }
  0x37   :  { %v146_v46 = vadd.f32 %v145_v41, %v131_v35  ;;  %v157_v47 = vmax.f32 %v156_v42, 0.0  ;;  %v168_v48 = vadd.f32 %v167_v43, %v164_v39  ;;  %v178_v49 = vstv %s290_s12  ;;  %s550_s16 = sld [smem:[#allocation11 + $0x6]] }
  0x38   :  { %v179_v50 = vmul.f32 %v178_v49, %v511_v0  ;;  %v181_v51 = vstv %s291_s0  ;;  %s553_s17 = sld [smem:[#allocation12 + $0x6]] }
  0x39   :  { %v160_v52 = vmul.f32 %v159_v44, %v157_v47  ;;  %v171_v53 = vadd.f32 %v170_v45, %v168_v48  ;;  %v182_v54 = vmul.f32 %v181_v51, %v513_v1  ;;  %s298_s18 = sld [smem:[#allocation8 + $0x7]]  ;;  %v185_v56 = vstv %s542_s13 }
  0x3a   :  { %s299_s2 = sld [smem:[#allocation9 + $0x7]]  ;;  %v189_v4 = vstv %s545_s14 }
  0x3b   :  { %v161_v57 = vadd.f32 %v160_v52, %v146_v46  ;;  %v172_v58 = vmax.f32 %v171_v53, 0.0  ;;  %v183_v59 = vadd.f32 %v182_v54, %v179_v50  ;;  %v193_v60 = vstv %s294_s15  ;;  %s558_s4 = sld [smem:[#allocation11 + $0x7]] }
  0x3c   :  { %v194_v61 = vmul.f32 %v193_v60, %v511_v0  ;;  %v196_v62 = vstv %s295_s1  ;;  %s561_s19 = sld [smem:[#allocation12 + $0x7]] }
  0x3d   :  { %v175_v63 = vmul.f32 %v174_v55, %v172_v58  ;;  %v186_v2 = vadd.f32 %v185_v56, %v183_v59  ;;  %v197_v3 = vmul.f32 %v196_v62, %v513_v1  ;;  %s302_s20 = sld [smem:[#allocation8 + $0x8]]  ;;  %v200_v5 = vstv %s550_s16 }
  0x3e   :  { %s303_s5 = sld [smem:[#allocation9 + $0x8]]  ;;  %v204_v15 = vstv %s553_s17 }
  0x3f   :  { %v176_v6 = vadd.f32 %v175_v63, %v161_v57  ;;  %v187_v7 = vmax.f32 %v186_v2, 0.0  ;;  %v198_v8 = vadd.f32 %v197_v3, %v194_v61  ;;  %v208_v9 = vstv %s298_s18  ;;  %s566_s21 = sld [smem:[#allocation11 + $0x8]] }
  0x40   :  { %v209_v10 = vmul.f32 %v208_v9, %v511_v0  ;;  %v211_v11 = vstv %s299_s2  ;;  %s569_s22 = sld [smem:[#allocation12 + $0x8]] }
  0x41   :  { %v190_v12 = vmul.f32 %v189_v4, %v187_v7  ;;  %v201_v13 = vadd.f32 %v200_v5, %v198_v8  ;;  %v212_v14 = vmul.f32 %v211_v11, %v513_v1  ;;  %s306_s23 = sld [smem:[#allocation8 + $0x9]]  ;;  %v215_v16 = vstv %s558_s4 }
  0x42   :  { %s307_s24 = sld [smem:[#allocation9 + $0x9]]  ;;  %v219_v26 = vstv %s561_s19 }
  0x43   :  { %v191_v17 = vadd.f32 %v190_v12, %v176_v6  ;;  %v202_v18 = vmax.f32 %v201_v13, 0.0  ;;  %v213_v19 = vadd.f32 %v212_v14, %v209_v10  ;;  %v223_v20 = vstv %s302_s20  ;;  %s308_s25 = sld [smem:[#allocation11 + $0x9]] }
  0x44   :  { %v224_v21 = vmul.f32 %v223_v20, %v511_v0  ;;  %v226_v22 = vstv %s303_s5  ;;  %s309_s26 = sld [smem:[#allocation12 + $0x9]] }
  0x45   :  { %v205_v23 = vmul.f32 %v204_v15, %v202_v18  ;;  %v216_v24 = vadd.f32 %v215_v16, %v213_v19  ;;  %v227_v25 = vmul.f32 %v226_v22, %v513_v1  ;;  %v230_v27 = vstv %s566_s21 }
  0x46   :  { %v234_v37 = vstv %s569_s22 }
  0x47   :  { %v206_v28 = vadd.f32 %v205_v23, %v191_v17  ;;  %v217_v29 = vmax.f32 %v216_v24, 0.0  ;;  %v228_v30 = vadd.f32 %v227_v25, %v224_v21  ;;  %v238_v31 = vstv %s306_s23 }
  0x48   :  { %v239_v32 = vmul.f32 %v238_v31, %v511_v0  ;;  %v241_v33 = vstv %s307_s24 }
  0x49   :  { %v220_v34 = vmul.f32 %v219_v26, %v217_v29  ;;  %v231_v35 = vadd.f32 %v230_v27, %v228_v30  ;;  %v242_v36 = vmul.f32 %v241_v33, %v513_v1  ;;  %v245_v38 = vstv %s308_s25 }
  0x4a   :  { %v249_v44 = vstv %s309_s26 }
  0x4b   :  { %v221_v39 = vadd.f32 %v220_v34, %v206_v28  ;;  %v232_v40 = vmax.f32 %v231_v35, 0.0  ;;  %v243_v41 = vadd.f32 %v242_v36, %v239_v32 }
  0x4d   :  { %v235_v42 = vmul.f32 %v234_v37, %v232_v40  ;;  %v246_v43 = vadd.f32 %v245_v38, %v243_v41 }
  0x4f   :  { %v236_v45 = vadd.f32 %v235_v42, %v221_v39  ;;  %v247_v46 = vmax.f32 %v246_v43, 0.0 }
  0x51   :  { %v250_v0 = vmul.f32 %v249_v44, %v247_v46 }
  0x53   :  { %v251_v47 = vadd.f32 %v250_v0, %v236_v45 }
  0x55   :  { %252 = vst [vmem:[#allocation14] sm:$0xff] %v251_v47 }
  0x56   :  { %263 = dma.vmem_to_hbm [thread:$0]  %s259_s28, 128, %s261_s7, [#allocation4]  }
  0x57   :  { %447 = dma.done.wait [#allocation4], 128  }
  0x58   :  { %448 = vsyncadd [#allocation4], 4294967168 }
  0x59   :  { %268 = vsyncpa [#allocation3], 1 }
  0x5a   :  { %269 = vsyncpa [#allocation7], 1 }
  0x5b   :  { %270 = vsyncpa [#allocation4], 1 }
  0x5c   :  { %271 = vsyncpa [#allocation5], 1 }
  0x5d   :  { %272 = vsyncpa [#allocation10], 1 }
  0x5e   :  { %273 = vsyncpa [#allocation13], 1 }

</bundles_post_ra>
